<compile_context>
chip_gen: v7x
topology: tpu7x:2x2x1
jax: 0.10.0
libtpu: 0.0.40
codegen_flags: <defaults>
</compile_context>

<pallas_src>
import math
import functools

import jax
import jax.numpy as jnp
from jax import lax
from jax.experimental import pallas as pl
from jax.experimental.pallas import tpu as pltpu


def _round_up(n, m):
    return ((n + m - 1) // m) * m


def _ln_kernel_rowwise(alpha_ref, bias_ref, x_ref, o_ref, *, eps, hidden):
    """One logical row per physical row.  x_ref block: (tile_rows, hidden)."""
    alpha = alpha_ref[0]
    bias = bias_ref[0]
    x = x_ref[...].astype(jnp.float32)
    mean = jnp.mean(x, axis=-1, keepdims=True)                       # (T, 1)
    diff = x - mean
    # torch.std default = unbiased estimator (divide by N-1), eps added to std.
    var = jnp.sum(diff * diff, axis=-1, keepdims=True) * (1.0 / (hidden - 1))
    denom = jnp.sqrt(var) + eps
    # EUP approximate reciprocal + one Newton step keeps the divide off the VPU.
    inv = pl.reciprocal(denom, approx=True)
    inv = inv * (2.0 - denom * inv)
    o_ref[...] = (diff * (alpha * inv) + bias).astype(o_ref.dtype)


def _ln_kernel_folded(alpha_ref, bias_ref, seg_ref, x_ref, o_ref, *, eps, hidden):
    """`group` logical rows packed along the 128-lane axis.

    x_ref block: (tile_rows, 128); seg_ref: (128, 128) bf16 block-diagonal 0/1
    indicator.  Segment sums via single-pass bf16 MXU matmuls (f32 accumulate);
    two-pass variance is kept for numerical robustness.
    """
    alpha = alpha_ref[0]
    bias = bias_ref[0]
    seg = seg_ref[...]                                               # (w, w) bf16
    x = x_ref[...].astype(jnp.float32)                               # (T, w)

    seg_sum = jnp.dot(x_ref[...].astype(jnp.bfloat16), seg,
                      precision=lax.Precision.DEFAULT,
                      preferred_element_type=jnp.float32)            # (T, w)
    mean = seg_sum * (1.0 / hidden)                                  # per-segment mean
    diff = x - mean
    seg_ss = jnp.dot((diff * diff).astype(jnp.bfloat16), seg,
                     precision=lax.Precision.DEFAULT,
                     preferred_element_type=jnp.float32)
    var = seg_ss * (1.0 / (hidden - 1))
    denom = jnp.sqrt(var) + eps

    inv = pl.reciprocal(denom, approx=True)
    inv = inv * (2.0 - denom * inv)
    o_ref[...] = (diff * (alpha * inv) + bias).astype(o_ref.dtype)


def layer_normalization(x, alpha, bias, eps=1e-6):
    """Pallas TPU forward of the PyTorch LayerNormalization module."""
    orig_shape = x.shape
    hidden = orig_shape[-1]
    dtype = x.dtype

    if hidden == 1:
        # torch.std over one element (unbiased) is NaN -> whole output is NaN.
        return jnp.full(orig_shape, jnp.nan, dtype=dtype)

    rows = math.prod(orig_shape[:-1]) if len(orig_shape) > 1 else 1
    x2 = x.reshape(rows, hidden)
    itemsize = jnp.dtype(dtype).itemsize

    # ---- lane folding for small hidden -------------------------------------
    group = 1
    width = hidden
    pad_rows = 0
    if hidden < 128 and 128 % hidden == 0:
        group = 128 // hidden
        width = 128
        if rows % group:
            # Rare ragged case: one tiny pad keeps every store full lane width
            # (cheaper than masked 32-wide stores).
            pad_rows = group - rows % group
            x2 = jnp.pad(x2, ((0, pad_rows), (0, 0)))
        x2 = x2.reshape((rows + pad_rows) // group, width)
    rows_eff = x2.shape[0]

    # ---- tile sizing --------------------------------------------------------
    # Sublane packing for the I/O dtype: f32 -> 8, bf16 -> 16, int8/fp8 -> 32.
    pack = max(8, 32 // max(1, itemsize))

    VMEM_LIMIT_BYTES = 40 * 1024 * 1024      # safe on v5e/v6e (128 MiB) and v7x (64 MiB/TC)
    VMEM_BUDGET_BYTES = 32 * 1024 * 1024     # conservative estimate target, below the limit
    IO_BLOCK_CAP_BYTES = 8 * 1024 * 1024     # keep HBM blocks large but bounded
    MIN_GRID_STEPS = 8                       # so the parallel axis shards across v7x's 2 TCs

    # Per-row VMEM estimate: double-buffered in+out blocks (I/O dtype) plus a
    # conservative count of block-sized f32 temporaries inside the kernel.
    n_f32_temps = 6 if group > 1 else 4
    per_row_bytes = width * (4 * itemsize + 4 * n_f32_temps)
    budget_rows = max(pack, VMEM_BUDGET_BYTES // per_row_bytes)
    io_cap_rows = max(pack, IO_BLOCK_CAP_BYTES // (width * itemsize))

    tile_rows = min(budget_rows, io_cap_rows)
    tile_rows = max(pack, (tile_rows // pack) * pack)
    # Ensure enough grid steps for megacore sharding (no-op on tiny inputs).
    steps_rows = _round_up(-(-rows_eff // MIN_GRID_STEPS), pack)
    tile_rows = min(tile_rows, max(pack, steps_rows))
    # Clamp to the array: ragged final block is fine, but keep block <= array.
    if rows_eff <= pack:
        tile_rows = rows_eff
    else:
        tile_rows = min(tile_rows, (rows_eff // pack) * pack)
    grid = pl.cdiv(rows_eff, tile_rows)      # ragged last block, no padding/copy

    # ---- build call ---------------------------------------------------------
    kernel_args = [alpha.astype(jnp.float32), bias.astype(jnp.float32)]
    in_specs = [
        pl.BlockSpec(memory_space=pltpu.MemorySpace.SMEM),   # alpha
        pl.BlockSpec(memory_space=pltpu.MemorySpace.SMEM),   # bias
    ]
    if group > 1:
        lane = jnp.arange(width, dtype=jnp.int32)
        seg = (lane[:, None] // hidden == lane[None, :] // hidden).astype(jnp.bfloat16)
        kernel_args.append(seg)
        in_specs.append(pl.BlockSpec((width, width), lambda i: (0, 0)))
        kernel = functools.partial(_ln_kernel_folded, eps=eps, hidden=hidden)
    else:
        kernel = functools.partial(_ln_kernel_rowwise, eps=eps, hidden=hidden)
    kernel_args.append(x2)
    in_specs.append(pl.BlockSpec((tile_rows, width), lambda i: (i, 0)))

    out = pl.pallas_call(
        kernel,
        out_shape=jax.ShapeDtypeStruct((rows_eff, width), dtype),
        grid=(grid,),
        in_specs=in_specs,
        out_specs=pl.BlockSpec((tile_rows, width), lambda i: (i, 0)),
        compiler_params=pltpu.CompilerParams(
            dimension_semantics=("parallel",),     # row grid shards across TCs
            vmem_limit_bytes=VMEM_LIMIT_BYTES,
        ),
    )(*kernel_args)

    if group > 1:
        out = out.reshape(rows + pad_rows, hidden)
        if pad_rows:
            out = out[:rows]
    return out.reshape(orig_shape)


def _reference(x, alpha, bias, eps=1e-6):
    xf = x.astype(jnp.float32)
    mean = jnp.mean(xf, axis=-1, keepdims=True)
    var = jnp.sum((xf - mean) ** 2, axis=-1, keepdims=True) / (x.shape[-1] - 1)
    std = jnp.sqrt(var)
    return (alpha[0] * (xf - mean) / (std + eps) + bias[0]).astype(x.dtype)


if __name__ == "__main__":
    key = jax.random.PRNGKey(0)

    # Deterministic params matching nn.Parameter(torch.ones(1)) / torch.zeros(1).
    alpha = jnp.ones((1,), dtype=jnp.float32)
    bias = jnp.zeros((1,), dtype=jnp.float32)

    # 1) Small-hidden shape: exercises the lane-folding (width=128) path with
    #    bf16 MXU segment statistics (tolerance covers bf16 stats rounding).
    batch, seq, hidden = 2, 8, 32
    x = jax.random.normal(key, (batch, seq, hidden), dtype=jnp.float32)
    out = jax.block_until_ready(layer_normalization(x, alpha, bias, eps=1e-6))
    ref = _reference(x, alpha, bias, eps=1e-6)
    assert out.shape == x.shape
    assert jnp.allclose(out, ref, atol=2e-3, rtol=2e-3), float(
        jnp.max(jnp.abs(out - ref)))

    # 2) Lane-dense shape: per-row path, multiple grid steps, all-f32 stats.
    x2 = jax.random.normal(jax.random.PRNGKey(1), (2, 64, 256), dtype=jnp.float32)
    out2 = jax.block_until_ready(layer_normalization(x2, alpha, bias, eps=1e-6))
    ref2 = _reference(x2, alpha, bias, eps=1e-6)
    assert out2.shape == x2.shape
    assert jnp.allclose(out2, ref2, atol=1e-3, rtol=1e-3), float(
        jnp.max(jnp.abs(out2 - ref2)))

    # 3) Row count not a multiple of the tile: exercises the ragged final
    #    block (no jnp.pad / output slice on this path).
    x3 = jax.random.normal(jax.random.PRNGKey(2), (3, 5, 256), dtype=jnp.float32)
    out3 = jax.block_until_ready(layer_normalization(x3, alpha, bias, eps=1e-6))
    ref3 = _reference(x3, alpha, bias, eps=1e-6)
    assert out3.shape == x3.shape
    assert jnp.allclose(out3, ref3, atol=1e-3, rtol=1e-3), float(
        jnp.max(jnp.abs(out3 - ref3)))

    print("KERNEL_OK")
</pallas_src>

<mosaic_0001>
module attributes {stable_mosaic.version = 11 : i64} {
  func.func @_ln_kernel_folded(%arg0: i32, %arg1: memref<1xf32, #tpu.memory_space<smem>>, %arg2: memref<1xf32, #tpu.memory_space<smem>>, %arg3: memref<128x128xbf16, #tpu.memory_space<vmem>>, %arg4: memref<4x128xf32, #tpu.memory_space<vmem>>, %arg5: memref<4x128xf32, #tpu.memory_space<vmem>>) attributes {dimension_semantics = [#tpu.dimension_semantics<parallel>], iteration_bounds = array<i64: 1>, scalar_prefetch = 0 : i64, scratch_operands = 0 : i64, tpu.core_type = #tpu.core_type<tc>, window_params = [{transform_indices = @transform_0, window_bounds = array<i64: 1>}, {transform_indices = @transform_1, window_bounds = array<i64: 1>}, {pipeline_mode = #tpu.pipeline_mode<synchronous>, transform_indices = @transform_2, window_bounds = array<i64: 128, 128>}, {transform_indices = @transform_3, window_bounds = array<i64: 4, 128>}, {transform_indices = @transform_4, window_bounds = array<i64: 4, 128>}]} {
    %c0 = arith.constant 0 : index
    %0 = memref.load %arg1[%c0] : memref<1xf32, #tpu.memory_space<smem>>
    %c0_0 = arith.constant 0 : index
    %1 = memref.load %arg2[%c0_0] : memref<1xf32, #tpu.memory_space<smem>>
    %c0_1 = arith.constant 0 : index
    %c0_2 = arith.constant 0 : index
    %2 = vector.load %arg3[%c0_1, %c0_2] : memref<128x128xbf16, #tpu.memory_space<vmem>>, vector<128x128xbf16>
    %c0_3 = arith.constant 0 : index
    %c0_4 = arith.constant 0 : index
    %3 = vector.load %arg4[%c0_3, %c0_4] : memref<4x128xf32, #tpu.memory_space<vmem>>, vector<4x128xf32>
    %c0_5 = arith.constant 0 : index
    %c0_6 = arith.constant 0 : index
    %4 = vector.load %arg4[%c0_5, %c0_6] : memref<4x128xf32, #tpu.memory_space<vmem>>, vector<4x128xf32>
    %5 = arith.truncf %4 : vector<4x128xf32> to vector<4x128xbf16>
    %cst = arith.constant dense<0.000000e+00> : vector<4x128xf32>
    %6 = tpu.matmul %5, %2, %cst {dimension_numbers = #tpu.dot_dimension_numbers<[1], [0], [0], [1], [0, 0, 1, 1], [], []>} : vector<4x128xbf16>, vector<128x128xbf16>, vector<4x128xf32> -> vector<4x128xf32>
    %cst_7 = arith.constant 3.125000e-02 : f32
    %7 = vector.broadcast %cst_7 : f32 to vector<4x128xf32>
    %8 = arith.mulf %6, %7 : vector<4x128xf32>
    %9 = arith.subf %3, %8 : vector<4x128xf32>
    %10 = arith.mulf %9, %9 : vector<4x128xf32>
    %11 = arith.truncf %10 : vector<4x128xf32> to vector<4x128xbf16>
    %cst_8 = arith.constant dense<0.000000e+00> : vector<4x128xf32>
    %12 = tpu.matmul %11, %2, %cst_8 {dimension_numbers = #tpu.dot_dimension_numbers<[1], [0], [0], [1], [0, 0, 1, 1], [], []>} : vector<4x128xbf16>, vector<128x128xbf16>, vector<4x128xf32> -> vector<4x128xf32>
    %cst_9 = arith.constant 0.0322580636 : f32
    %13 = vector.broadcast %cst_9 : f32 to vector<4x128xf32>
    %14 = arith.mulf %12, %13 : vector<4x128xf32>
    %15 = math.sqrt %14 : vector<4x128xf32>
    %cst_10 = arith.constant 9.99999997E-7 : f32
    %16 = vector.broadcast %cst_10 : f32 to vector<4x128xf32>
    %17 = arith.addf %15, %16 : vector<4x128xf32>
    %18 = tpu.reciprocal %17 {approx = true} : vector<4x128xf32> -> vector<4x128xf32>
    %19 = arith.mulf %17, %18 : vector<4x128xf32>
    %cst_11 = arith.constant 2.000000e+00 : f32
    %20 = vector.broadcast %cst_11 : f32 to vector<4x128xf32>
    %21 = arith.subf %20, %19 : vector<4x128xf32>
    %22 = arith.mulf %18, %21 : vector<4x128xf32>
    %23 = vector.broadcast %0 : f32 to vector<4x128xf32>
    %24 = arith.mulf %23, %22 : vector<4x128xf32>
    %25 = arith.mulf %9, %24 : vector<4x128xf32>
    %26 = vector.broadcast %1 : f32 to vector<4x128xf32>
    %27 = arith.addf %25, %26 : vector<4x128xf32>
    %c0_12 = arith.constant 0 : index
    %c0_13 = arith.constant 0 : index
    %28 = vector.load %arg5[%c0_12, %c0_13] : memref<4x128xf32, #tpu.memory_space<vmem>>, vector<4x128xf32>
    tpu.vector_store %arg5[%c0_12, %c0_13], %27 {strides = array<i32>} : memref<4x128xf32, #tpu.memory_space<vmem>>, vector<4x128xf32>,
    return
  }
  func.func @transform_0(%arg0: i32) -> i32 {
    %c0_i32 = arith.constant 0 : i32
    %c0_i32_0 = arith.constant 0 : i32
    return %c0_i32 : i32
  }
  func.func @transform_1(%arg0: i32) -> i32 {
    %c0_i32 = arith.constant 0 : i32
    %c0_i32_0 = arith.constant 0 : i32
    return %c0_i32 : i32
  }
  func.func @transform_2(%arg0: i32) -> (i32, i32) {
    %c0_i32 = arith.constant 0 : i32
    %c0_i32_0 = arith.constant 0 : i32
    %c0_i32_1 = arith.constant 0 : i32
    return %c0_i32, %c0_i32_0 : i32, i32
  }
  func.func @transform_3(%arg0: i32) -> (i32, i32) {
    %c0_i32 = arith.constant 0 : i32
    %c0_i32_0 = arith.constant 0 : i32
    return %arg0, %c0_i32 : i32, i32
  }
  func.func @transform_4(%arg0: i32) -> (i32, i32) {
    %c0_i32 = arith.constant 0 : i32
    %c0_i32_0 = arith.constant 0 : i32
    return %arg0, %c0_i32 : i32, i32
  }
}

</mosaic_0001>

<bundles_post_ra>
// kernel: tpu_custom_call.1
= control target key start
LH: loop header
LB: loop body
LE: loop exit
PB: predicated region body
PF: predicated region fallthrough
CT: control target
= control target key end

     0   :  { %11 = vsyncpa [#allocation5], 0  ;;  %s417_s0 = inlined_call_operand.<no memory space> [shape: f32[1], index: 0, kind: input, shape index: {}]   ;;  %s418_s1 = inlined_call_operand.<no memory space> [shape: f32[1], index: 1, kind: input, shape index: {}]   ;;  %s419_s2 = inlined_call_operand.hbm [shape: bf16[128,128], index: 2, kind: input, shape index: {}]   ;;  %s420_s3 = inlined_call_operand.vmem [shape: f32[4,128], index: 3, kind: input, shape index: {}]   ;;  %s421_s4 = inlined_call_operand.hbm [shape: f32[4,128], index: 4, kind: output, shape index: {}]  }
   0x1   :  { %12 = vsyncpa [#allocation6], 0  ;;  %s353_s15 = smov [#allocation4]   ;;  %s305_s19 = scalar_lea.hbm %s419_s2, 1024 }
   0x2   :  { %s22_s16 = sshll.u32 %s353_s15, 4  ;;  %p306_p0 = scmp.ne.s32.totalorder %s419_s2, %s305_s19  ;;  %s23_s16 = int_to_ptr.vmem [resolvable:$true] %s22_s16 }
   0x3   :  { %p309_p1 = scmp.lt.u32.totalorder %s305_s19, %s419_s2 }
   0x5   :  { %p311_p2 = pnand %p309_p1, %p306_p0 }
   0x7   :  { %314 = shalt.err (!%p311_p2)
}
   0x8   :  { %s315_s24 = scalar_lea.vmem %s23_s16, 1024  ;;  %p320_p4 = scmp.lt.s32.totalorder %s23_s16, %s23_s16 }
   0x9   :  { %p316_p3 = scmp.ne.s32.totalorder %s23_s16, %s315_s24  ;;  %p321_p5 = scmp.lt.s32.totalorder %s315_s24, %s315_s24 }
   0xb   :  { %p322_p6 = por %p321_p5, %p320_p4 }
   0xd   :  { %p323_p7 = pnand %p322_p6, %p316_p3 }
   0xf   :  { %326 = shalt.err (!%p323_p7)
}
  0x10   :  { %s354_s25 = smov 64   ;;  %s355_s26 = smov 4  }
  0x11   :  { %28 = dma.hbm_to_vmem [thread:$0]  %s419_s2, 1024, %s23_s16, [#allocation5], %s354_s25, %s354_s25, %s355_s26  }
  0x12   :  { %349 = dma.done.wait [#allocation5], 1024  }
  0x13   :  { %350 = vsyncadd [#allocation5], 4294966272  ;;  %v356_v0 = vmov 0.0   ;;  %vm357_vm0 = vmmov 0   ;;  %v293_v1 = vld [vmem:[#allocation4] sm:$0xff]   ;;  %v294_v2 = vld [vmem:[#allocation4 + $0x8] sm:$0xff]   ;;  %v200_v33 = vstv %s417_s0  ;;  %v203_v36 = vstv %s418_s1 }
  0x14   :  { %247 = vmatprep.subr.bf16.mxu0 %v356_v0  ;;  %263 = vmatprep.mubr.msk.bf16.mxu0 %vm357_vm0, %v356_v0  ;;  %v295_v3 = vld [vmem:[#allocation4 + $0x10] sm:$0xff]   ;;  %v296_v4 = vld [vmem:[#allocation4 + $0x18] sm:$0xff]   ;;  %v297_v5 = vld [vmem:[#allocation4 + $0x20] sm:$0xff]   ;;  %s358_s7 = smov [#allocation7]  }
  0x15   :  { %267 = vmatprep.subr.bf16.mxu1 %v356_v0  ;;  %283 = vmatprep.mubr.msk.bf16.mxu1 %vm357_vm0, %v356_v0  ;;  %v298_v6 = vld [vmem:[#allocation4 + $0x28] sm:$0xff]   ;;  %v299_v7 = vld [vmem:[#allocation4 + $0x30] sm:$0xff]   ;;  %v300_v8 = vld [vmem:[#allocation4 + $0x38] sm:$0xff]   ;;  %s212_s8 = sshll.u32 %s358_s7, 4  ;;  %s213_s8 = int_to_ptr.vmem [resolvable:$true] %s212_s8 }
  0x16   :  { %248 = vmatpush3.bf16.msra.mxu0 %v293_v1  ;;  %268 = vmatpush3.bf16.msra.mxu1 %v293_v1  ;;  %v53_v9 = vld [vmem:[%s420_s3] sm:$0xf]  ;;  %s327_s9 = scalar_lea.vmem %s213_s8, 64  ;;  %p332_p9 = scmp.lt.s32.totalorder %s213_s8, %s213_s8 }
  0x17   :  { %249 = vmatprep.subr.bf16.mxu0 %v356_v0  ;;  %269 = vmatprep.subr.bf16.mxu1 %v356_v0  ;;  %v54_v10 = vpack.c.bf16 %v53_v9, %v53_v9  ;;  %p328_p8 = scmp.ne.s32.totalorder %s213_s8, %s327_s9  ;;  %p333_p10 = scmp.lt.s32.totalorder %s327_s9, %s327_s9 }
  0x19   :  { %p334_p11 = por %p333_p10, %p332_p9 }
  0x1a   :  { %250 = vmatpush3.bf16.msra.mxu0 %v294_v2  ;;  %270 = vmatpush3.bf16.msra.mxu1 %v294_v2 }
  0x1b   :  { %251 = vmatprep.subr.bf16.mxu0 %v356_v0  ;;  %271 = vmatprep.subr.bf16.mxu1 %v356_v0  ;;  %p335_p12 = pnand %p334_p11, %p328_p8 }
  0x1e   :  { %252 = vmatpush3.bf16.msra.mxu0 %v295_v3  ;;  %272 = vmatpush3.bf16.msra.mxu1 %v295_v3 }
  0x1f   :  { %253 = vmatprep.subr.bf16.mxu0 %v356_v0  ;;  %273 = vmatprep.subr.bf16.mxu1 %v356_v0 }
  0x22   :  { %254 = vmatpush3.bf16.msra.mxu0 %v296_v4  ;;  %274 = vmatpush3.bf16.msra.mxu1 %v296_v4 }
  0x23   :  { %255 = vmatprep.subr.bf16.mxu0 %v356_v0  ;;  %275 = vmatprep.subr.bf16.mxu1 %v356_v0 }
  0x26   :  { %256 = vmatpush3.bf16.msra.mxu0 %v297_v5  ;;  %276 = vmatpush3.bf16.msra.mxu1 %v297_v5 }
  0x27   :  { %257 = vmatprep.subr.bf16.mxu0 %v356_v0  ;;  %277 = vmatprep.subr.bf16.mxu1 %v356_v0 }
  0x2a   :  { %258 = vmatpush3.bf16.msra.mxu0 %v298_v6  ;;  %278 = vmatpush3.bf16.msra.mxu1 %v298_v6 }
  0x2b   :  { %259 = vmatprep.subr.bf16.mxu0 %v356_v0  ;;  %279 = vmatprep.subr.bf16.mxu1 %v356_v0 }
  0x2e   :  { %260 = vmatpush3.bf16.msra.mxu0 %v299_v7  ;;  %280 = vmatpush3.bf16.msra.mxu1 %v299_v7 }
  0x2f   :  { %261 = vmatprep.subr.bf16.mxu0 %v356_v0  ;;  %281 = vmatprep.subr.bf16.mxu1 %v356_v0 }
  0x32   :  { %262 = vmatpush3.bf16.msra.mxu0 %v300_v8  ;;  %282 = vmatpush3.bf16.msra.mxu1 %v300_v8 }
  0x35   :  { %264 = vmatmul.mubr.bf16.vlgmr.msra.gmra.mrb[0].mxu0 %v54_v10 }
 0x108   :  { %v137_v11 = vpop.f32.mrb[0].mxu0 }
 0x109   :  { %v143_v12 = vmul.f32 0.03125, %v137_v11  ;;  %v265_v13 = vpop.f32.mrb[1].mxu0 }
 0x10a   :  { %v140_v14 = vpop.f32.mrb[2].mxu0 }
 0x10b   :  { %v144_v15 = vsub.f32 %v53_v9, %v143_v12  ;;  %v266_v16 = vpop.f32.mrb[3].mxu0 }
 0x10d   :  { %v145_v17 = vmul.f32 %v144_v15, %v144_v15 }
 0x10f   :  { %v146_v18 = vpack.c.bf16 %v145_v17, %v145_v17 }
 0x111   :  { %284 = vmatmul.mubr.bf16.vlgmr.msra.gmra.mrb[0].mxu1 %v146_v18 }
 0x1e4   :  { %v181_v19 = vpop.f32.mrb[0].mxu1 }
 0x1e5   :  { %v187_v20 = vmul.f32 0.032258064, %v181_v19  ;;  %v285_v21 = vpop.f32.mrb[1].mxu1 }
 0x1e6   :  { %v184_v22 = vpop.f32.mrb[2].mxu1 }
 0x1e7   :  { %301 = vrsqrt.f32 %v187_v20  ;;  %v286_v23 = vpop.f32.mrb[3].mxu1  ;;  %vm190_vm1 = vcmp.eq.f32.partialorder %v187_v20, inf  ;;  %v193_v26 = vand.u32 2147483648, %v187_v20  ;;  %vm192_vm2 = vcmp.eq.f32.partialorder %v187_v20, 0.0 }
 0x1f1   :  { %v302_v24 = vpop.eup %301 }
 0x1f2   :  { %v189_v25 = vmul.f32 %v302_v24, %v187_v20 }
 0x1f4   :  { %v191_v27 = vsel %vm190_vm1, %v187_v20, %v189_v25 }
 0x1f5   :  { %v194_v28 = vsel %vm192_vm2, %v193_v26, %v191_v27 }
 0x1f6   :  { %v195_v29 = vadd.f32 1e-06, %v194_v28 }
 0x1f8   :  { %303 = vrcp.f32 %v195_v29 }
 0x202   :  { %v304_v30 = vpop.eup %303 }
 0x203   :  { %v197_v31 = vmul.f32 %v304_v30, %v195_v29 }
 0x205   :  { %v198_v32 = vsub.f32 2.0, %v197_v31 }
 0x207   :  { %v199_v34 = vmul.f32 %v304_v30, %v198_v32 }
 0x209   :  { %v201_v35 = vmul.f32 %v200_v33, %v199_v34 }
 0x20b   :  { %v202_v37 = vmul.f32 %v201_v35, %v144_v15 }
 0x20d   :  { %v204_v38 = vadd.f32 %v203_v36, %v202_v37 }
 0x20f   :  { %205 = vst [vmem:[#allocation7] sm:$0xf] %v204_v38 }
 0x210   :  { %338 = shalt.err (!%p335_p12)
}
 0x211   :  { %s339_s11 = scalar_lea.hbm %s421_s4, 64 }
 0x212   :  { %p340_p13 = scmp.ne.s32.totalorder %s421_s4, %s339_s11  ;;  %p343_p0 = scmp.lt.u32.totalorder %s339_s11, %s421_s4 }
 0x214   :  { %p345_p1 = pnand %p343_p0, %p340_p13 }
 0x216   :  { %348 = shalt.err (!%p345_p1)
}
 0x217   :  { %215 = dma.vmem_to_hbm [thread:$0]  %s213_s8, 64, %s421_s4, [#allocation6]  }
 0x218   :  { %351 = dma.done.wait [#allocation6], 64  }
 0x219   :  { %352 = vsyncadd [#allocation6], 4294967232 }
 0x21a   :  { %219 = vsyncpa [#allocation5], 1 }
 0x21b   :  { %220 = vsyncpa [#allocation6], 1 }

</bundles_post_ra>
